<compile_context>
chip_gen: v7x
topology: tpu7x:2x2x1
jax: 0.10.0
libtpu: 0.0.40
codegen_flags: <defaults>
</compile_context>

<pallas_src>
import math
import functools

import jax
import jax.numpy as jnp
import numpy as np
from jax import lax
from jax.experimental import pallas as pl
from jax.experimental.pallas import tpu as pltpu

NEG_SLOPE = 0.01  # nn.LeakyReLU(negative_slope=0.01)


def _leaky_relu(x):
    return jnp.where(x >= 0, x, NEG_SLOPE * x)


# ---------------------------------------------------------------------------
# Fused kernel: conv encoder + quantile embedding + modulation + dueling heads
# + dueling combine.  One grid step per batch element (all Q quantiles batched).
# ---------------------------------------------------------------------------
def iqn_fused_kernel(x_ref, wc_ref, tau_ref, wq_ref, wh_ref, bh_ref, o_ref):
    num_a = wh_ref.shape[0] - 1          # A   (A+1 rows = A-head rows + V-head row)
    iqn_d = wq_ref.shape[0] - 1          # D   (D+1 rows: last row is the folded iqn_fc bias)
    num_q = tau_ref.shape[1]             # Q

    # --- ConvEncoder: 5x5 "same" conv == ONE matmul over the K*K*C(+1 bias) taps, + LeakyReLU.
    #     Transposed layout keeps the spatial axis (W*H) in the lane dimension.
    obs_t = _leaky_relu(
        jnp.dot(wc_ref[...], x_ref[0], preferred_element_type=jnp.float32))       # (E, P)

    # --- Quantile embedding: cos(k*pi*tau), k = 1..D (torch.arange(1, D+1)); the extra column of
    #     ones picks up the iqn_fc bias folded into wq_ref.  Then Linear + LeakyReLU.
    tau_col = tau_ref[0]                                                           # (Q, 1)
    d_idx = lax.broadcasted_iota(jnp.int32, (num_q, iqn_d + 1), 1)
    emb = jnp.where(d_idx < iqn_d,
                    jnp.cos((d_idx + 1).astype(jnp.float32) * math.pi * tau_col),
                    1.0)                                                           # (Q, D+1)
    qh = _leaky_relu(
        jnp.dot(emb, wq_ref[...], preferred_element_type=jnp.float32))            # (Q, E)

    # --- FiLM modulation folded into the merged A/V head weights:
    #     G[a, q, e] = W_head[a, e] * qh[q, e]  ->  one matmul for all quantiles + both heads.
    g = wh_ref[...][:, None, :] * qh[None, :, :]                                   # (A+1, Q, E)
    g2 = g.reshape((num_a + 1) * num_q, g.shape[-1])                               # ((A+1)*Q, E)
    h = jnp.dot(g2, obs_t, preferred_element_type=jnp.float32)                     # ((A+1)*Q, P)
    h3 = h.reshape(num_a + 1, num_q, h.shape[-1])                                  # (A+1, Q, P)
    h3 = _leaky_relu(h3 + bh_ref[...][:, :, None])                                 # head bias + LeakyReLU

    # --- Dueling combine: V + A - mean_A(A).  Action axis is the cheap leading axis here.
    adv = h3[:num_a]                                                               # (A, Q, P)
    val = h3[num_a:num_a + 1]                                                      # (1, Q, P)
    o_ref[0] = val + adv - jnp.mean(adv, axis=0, keepdims=True)                    # (A, Q, P)


# ---------------------------------------------------------------------------
# Forward pass (host glue = layout only; all heavy compute in the Pallas kernel)
# ---------------------------------------------------------------------------
def iqn_forward(params, observation, tau, *, num_quantiles):
    if observation.ndim == 3:
        observation = observation[None]
    N, C, W, H = observation.shape
    Q = num_quantiles
    K = params["conv_w"].shape[0]
    E = params["conv_w"].shape[-1]
    D = params["iqn_w"].shape[0]
    A = params["a_w"].shape[-1]
    P = W * H
    pad = K // 2

    # ---- host-side layout glue: im2col slab, transposes, weight/bias packing ----
    x = jnp.transpose(observation.astype(jnp.float32), (0, 2, 3, 1))               # (N, W, H, C)
    xp = jnp.pad(x, ((0, 0), (pad, pad), (pad, pad), (0, 0)))
    taps = [xp[:, kh:kh + W, kw:kw + H, :].reshape(N, P, C)
            for kh in range(K) for kw in range(K)]                                  # (kh, kw, c) order
    x_t = jnp.transpose(jnp.concatenate(taps, axis=-1), (0, 2, 1))                  # (N, K*K*C, P)
    x_aug = jnp.concatenate([x_t, jnp.ones((N, 1, P), jnp.float32)], axis=1)        # ones row = conv bias

    conv_wt = jnp.concatenate(
        [params["conv_w"].reshape(K * K * C, E), params["conv_b"][None, :]], axis=0).T   # (E, K*K*C+1)
    iqn_w_aug = jnp.concatenate([params["iqn_w"], params["iqn_b"][None, :]], axis=0)      # (D+1, E)
    head_wt = jnp.concatenate([params["a_w"], params["v_w"]], axis=1).T                   # (A+1, E)
    head_b = jnp.concatenate([params["a_b"], params["v_b"]])[:, None]                     # (A+1, 1)

    # torch obs.repeat(Q,1,1): flat row i = q*N + n uses obs[n] and tau[i].  Group the Q taus that
    # belong to obs slot n so each grid step handles all its quantiles in one shot.
    tau_knl = jnp.transpose(tau.reshape(Q, N), (1, 0))[:, :, None]                  # (N, Q, 1)

    out = pl.pallas_call(
        iqn_fused_kernel,
        out_shape=jax.ShapeDtypeStruct((N, A, Q, P), jnp.float32),
        grid=(N,),
        in_specs=[
            pl.BlockSpec((1, K * K * C + 1, P), lambda n: (n, 0, 0)),    # im2col slab (lane = W*H)
            pl.BlockSpec((E, K * K * C + 1), lambda n: (0, 0)),          # conv weight (+bias row)
            pl.BlockSpec((1, Q, 1), lambda n: (n, 0, 0)),                # taus for this batch slot
            pl.BlockSpec((D + 1, E), lambda n: (0, 0)),                  # iqn_fc weight (+bias row)
            pl.BlockSpec((A + 1, E), lambda n: (0, 0)),                  # merged A/V head weights
            pl.BlockSpec((A + 1, 1), lambda n: (0, 0)),                  # merged A/V head biases
        ],
        out_specs=pl.BlockSpec((1, A, Q, P), lambda n: (n, 0, 0, 0)),    # lane-dense output slab
        compiler_params=pltpu.CompilerParams(
            dimension_semantics=("parallel",)),                          # uses both TCs on v7x
    )(x_aug, conv_wt, tau_knl, iqn_w_aug, head_wt, head_b)               # (N, A, Q, P)

    # Undo the lane-dense transposed output layout and reproduce torch's exact ordering:
    # pre-view flat row i = q*N + n (from .repeat(Q,1,1)), then .view(N, Q, W*H, A).
    quantiles_flat = jnp.transpose(out, (2, 0, 3, 1)).reshape(Q * N, P, A)
    quantiles = quantiles_flat.reshape(N, Q, P, A)
    actions = jnp.argmax(jnp.mean(quantiles, axis=1), axis=-1)           # (N, W*H)
    tau_out = tau.reshape(N, Q, 1)
    return actions, quantiles, tau_out


# ---------------------------------------------------------------------------
# Parameters (kaiming_normal leaky_relu gain; biases = 0), deterministic.
# conv_w[kh, kw, c, e] corresponds to torch Conv2d weight[e, c, kh, kw];
# iqn_w/a_w/v_w are the torch Linear weights transposed to (in, out).
# ---------------------------------------------------------------------------
def init_iqn_params(key, feature_size, embed_size, iqn_dim, num_actions, kernel_size=5):
    C, E, D, A, K = feature_size, embed_size, iqn_dim, num_actions, kernel_size
    k1, k2, k3, k4 = jax.random.split(key, 4)

    def kaiming(k, shape, fan_in):
        return math.sqrt(2.0 / fan_in) * jax.random.normal(k, shape, jnp.float32)

    return {
        "conv_w": kaiming(k1, (K, K, C, E), C * K * K),
        "conv_b": jnp.zeros((E,), jnp.float32),
        "iqn_w": kaiming(k2, (D, E), D),
        "iqn_b": jnp.zeros((E,), jnp.float32),
        "a_w": kaiming(k3, (E, A), E),
        "a_b": jnp.zeros((A,), jnp.float32),
        "v_w": kaiming(k4, (E, 1), E),
        "v_b": jnp.zeros((1,), jnp.float32),
    }


# ---------------------------------------------------------------------------
# Pure-JAX reference (straight transcription of the PyTorch forward) for a self-check.
# ---------------------------------------------------------------------------
def iqn_forward_reference(params, observation, tau, *, num_quantiles):
    if observation.ndim == 3:
        observation = observation[None]
    N, C, W, H = observation.shape
    Q = num_quantiles
    K = params["conv_w"].shape[0]
    E = params["conv_w"].shape[-1]
    D = params["iqn_w"].shape[0]
    A = params["a_w"].shape[-1]
    pad = K // 2

    w_oihw = jnp.transpose(params["conv_w"], (3, 2, 0, 1))              # (E, C, K, K)
    conv = lax.conv_general_dilated(observation.astype(jnp.float32), w_oihw, (1, 1),
                                    ((pad, pad), (pad, pad)),
                                    dimension_numbers=("NCHW", "OIHW", "NCHW"))
    conv = conv + params["conv_b"][None, :, None, None]
    obs = _leaky_relu(conv).reshape(N, E, W * H).transpose(0, 2, 1)     # (N, P, E)

    k_arange = jnp.arange(1, D + 1, dtype=jnp.float32)
    emb = jnp.cos(k_arange[None, :] * math.pi * tau)                    # (N*Q, D)
    qh = _leaky_relu(emb @ params["iqn_w"] + params["iqn_b"])           # (N*Q, E)

    obs_rep = jnp.tile(obs, (Q, 1, 1))                                  # row i = obs[i % N]
    mod = obs_rep * qh[:, None, :]
    adv = _leaky_relu(mod @ params["a_w"] + params["a_b"])
    val = _leaky_relu(mod @ params["v_w"] + params["v_b"])
    quantiles = (val + adv - adv.mean(axis=-1, keepdims=True)).reshape(N, Q, W * H, A)
    actions = jnp.argmax(quantiles.mean(axis=1), axis=-1)
    return actions, quantiles, tau.reshape(N, Q, 1)


if __name__ == "__main__":
    feature_size, embed_size = 4, 32
    iqn_embedding_dimension, num_actions, num_quantiles = 32, 4, 8
    N, W, H = 2, 16, 16

    key = jax.random.PRNGKey(0)
    k_params, k_obs, k_tau = jax.random.split(key, 3)
    params = init_iqn_params(k_params, feature_size, embed_size,
                             iqn_embedding_dimension, num_actions)
    observation = jax.random.uniform(k_obs, (N, feature_size, W, H), jnp.float32)
    # TODO(synk): torch.rand is drawn inside forward(); here tau is sampled once with
    # jax.random (deterministic) and passed in explicitly.
    tau = jax.random.uniform(k_tau, (N * num_quantiles, 1), jnp.float32)

    fwd = jax.jit(functools.partial(iqn_forward, num_quantiles=num_quantiles))
    actions, quantiles, tau_out = fwd(params, observation, tau)
    jax.block_until_ready((actions, quantiles, tau_out))

    assert actions.shape == (N, W * H)
    assert quantiles.shape == (N, num_quantiles, W * H, num_actions)
    assert tau_out.shape == (N, num_quantiles, 1)

    # Self-check against the plain-JAX transcription of the PyTorch forward.
    ref_actions, ref_quant, ref_tau = iqn_forward_reference(
        params, observation, tau, num_quantiles=num_quantiles)
    np.testing.assert_allclose(np.asarray(quantiles), np.asarray(ref_quant),
                               rtol=1e-4, atol=1e-4)
    np.testing.assert_allclose(np.asarray(tau_out), np.asarray(ref_tau), rtol=0, atol=0)
    # Compare argmax actions only where the decision margin is not a float-level tie.
    qmean = np.asarray(ref_quant).mean(axis=1)
    srt = np.sort(qmean, axis=-1)
    decisive = (srt[..., -1] - srt[..., -2]) > 1e-3
    assert np.all((np.asarray(actions) == np.asarray(ref_actions)) | ~decisive)

    print("KERNEL_OK")
</pallas_src>

<mosaic_0001>
module attributes {stable_mosaic.version = 11 : i64} {
  func.func @iqn_fused_kernel(%arg0: i32, %arg1: memref<1x101x256xf32, #tpu.memory_space<vmem>>, %arg2: memref<32x101xf32, #tpu.memory_space<vmem>>, %arg3: memref<1x8x1xf32, #tpu.memory_space<vmem>>, %arg4: memref<33x32xf32, #tpu.memory_space<vmem>>, %arg5: memref<5x32xf32, #tpu.memory_space<vmem>>, %arg6: memref<5x1xf32, #tpu.memory_space<vmem>>, %arg7: memref<1x4x8x256xf32, #tpu.memory_space<vmem>>) attributes {dimension_semantics = [#tpu.dimension_semantics<parallel>], iteration_bounds = array<i64: 2>, scalar_prefetch = 0 : i64, scratch_operands = 0 : i64, tpu.core_type = #tpu.core_type<tc>, window_params = [{transform_indices = @transform_0, window_bounds = array<i64: 1, 101, 256>}, {pipeline_mode = #tpu.pipeline_mode<synchronous>, transform_indices = @transform_1, window_bounds = array<i64: 32, 101>}, {transform_indices = @transform_2, window_bounds = array<i64: 1, 8, 1>}, {pipeline_mode = #tpu.pipeline_mode<synchronous>, transform_indices = @transform_3, window_bounds = array<i64: 33, 32>}, {pipeline_mode = #tpu.pipeline_mode<synchronous>, transform_indices = @transform_4, window_bounds = array<i64: 5, 32>}, {pipeline_mode = #tpu.pipeline_mode<synchronous>, transform_indices = @transform_5, window_bounds = array<i64: 5, 1>}, {transform_indices = @transform_6, window_bounds = array<i64: 1, 4, 8, 256>}]} {
    %c0 = arith.constant 0 : index
    %c0_0 = arith.constant 0 : index
    %0 = vector.load %arg2[%c0, %c0_0] : memref<32x101xf32, #tpu.memory_space<vmem>>, vector<32x101xf32>
    %c0_1 = arith.constant 0 : index
    %c0_2 = arith.constant 0 : index
    %c0_3 = arith.constant 0 : index
    %1 = vector.load %arg1[%c0_1, %c0_2, %c0_3] : memref<1x101x256xf32, #tpu.memory_space<vmem>>, vector<1x101x256xf32>
    %2 = vector.shape_cast %1 : vector<1x101x256xf32> to vector<101x256xf32>
    %cst = arith.constant dense<0.000000e+00> : vector<32x256xf32>
    %3 = tpu.matmul %0, %2, %cst {dimension_numbers = #tpu.dot_dimension_numbers<[1], [0], [0], [1], [0, 0, 1, 1], [], []>} : vector<32x101xf32>, vector<101x256xf32>, vector<32x256xf32> -> vector<32x256xf32>
    %cst_4 = arith.constant 0.000000e+00 : f32
    %4 = vector.broadcast %cst_4 : f32 to vector<32x256xf32>
    %5 = arith.cmpf oge, %3, %4 : vector<32x256xf32>
    %cst_5 = arith.constant 0.00999999977 : f32
    %6 = vector.broadcast %cst_5 : f32 to vector<32x256xf32>
    %7 = arith.mulf %6, %3 : vector<32x256xf32>
    %8 = arith.select %5, %3, %7 : vector<32x256xi1>, vector<32x256xf32>
    %c0_6 = arith.constant 0 : index
    %c0_7 = arith.constant 0 : index
    %c0_8 = arith.constant 0 : index
    %9 = vector.load %arg3[%c0_6, %c0_7, %c0_8] : memref<1x8x1xf32, #tpu.memory_space<vmem>>, vector<1x8x1xf32>
    %10 = vector.shape_cast %9 : vector<1x8x1xf32> to vector<8x1xf32>
    %11 = tpu.iota {dimensions = array<i32: 1>} : vector<8x33xi32>
    %c32_i32 = arith.constant 32 : i32
    %12 = vector.broadcast %c32_i32 : i32 to vector<8x33xi32>
    %13 = arith.cmpi slt, %11, %12 : vector<8x33xi32>
    %c1_i32 = arith.constant 1 : i32
    %14 = vector.broadcast %c1_i32 : i32 to vector<8x33xi32>
    %15 = arith.addi %11, %14 : vector<8x33xi32>
    %16 = arith.sitofp %15 : vector<8x33xi32> to vector<8x33xf32>
    %cst_9 = arith.constant 3.14159274 : f32
    %17 = vector.broadcast %cst_9 : f32 to vector<8x33xf32>
    %18 = arith.mulf %16, %17 : vector<8x33xf32>
    %19 = vector.broadcast %10 : vector<8x1xf32> to vector<8x33xf32>
    %20 = arith.mulf %18, %19 : vector<8x33xf32>
    %21 = math.cos %20 : vector<8x33xf32>
    %cst_10 = arith.constant 1.000000e+00 : f32
    %22 = vector.broadcast %cst_10 : f32 to vector<8x33xf32>
    %23 = arith.select %13, %21, %22 : vector<8x33xi1>, vector<8x33xf32>
    %c0_11 = arith.constant 0 : index
    %c0_12 = arith.constant 0 : index
    %24 = vector.load %arg4[%c0_11, %c0_12] : memref<33x32xf32, #tpu.memory_space<vmem>>, vector<33x32xf32>
    %cst_13 = arith.constant dense<0.000000e+00> : vector<8x32xf32>
    %25 = tpu.matmul %23, %24, %cst_13 {dimension_numbers = #tpu.dot_dimension_numbers<[1], [0], [0], [1], [0, 0, 1, 1], [], []>} : vector<8x33xf32>, vector<33x32xf32>, vector<8x32xf32> -> vector<8x32xf32>
    %cst_14 = arith.constant 0.000000e+00 : f32
    %26 = vector.broadcast %cst_14 : f32 to vector<8x32xf32>
    %27 = arith.cmpf oge, %25, %26 : vector<8x32xf32>
    %cst_15 = arith.constant 0.00999999977 : f32
    %28 = vector.broadcast %cst_15 : f32 to vector<8x32xf32>
    %29 = arith.mulf %28, %25 : vector<8x32xf32>
    %30 = arith.select %27, %25, %29 : vector<8x32xi1>, vector<8x32xf32>
    %c0_16 = arith.constant 0 : index
    %c0_17 = arith.constant 0 : index
    %31 = vector.load %arg5[%c0_16, %c0_17] : memref<5x32xf32, #tpu.memory_space<vmem>>, vector<5x32xf32>
    %32 = vector.shape_cast %31 : vector<5x32xf32> to vector<5x1x32xf32>
    %33 = vector.shape_cast %30 : vector<8x32xf32> to vector<1x8x32xf32>
    %34 = vector.broadcast %32 : vector<5x1x32xf32> to vector<5x8x32xf32>
    %35 = vector.broadcast %33 : vector<1x8x32xf32> to vector<5x8x32xf32>
    %36 = arith.mulf %34, %35 : vector<5x8x32xf32>
    %37 = vector.shape_cast %36 : vector<5x8x32xf32> to vector<40x32xf32>
    %cst_18 = arith.constant dense<0.000000e+00> : vector<40x256xf32>
    %38 = tpu.matmul %37, %8, %cst_18 {dimension_numbers = #tpu.dot_dimension_numbers<[1], [0], [0], [1], [0, 0, 1, 1], [], []>} : vector<40x32xf32>, vector<32x256xf32>, vector<40x256xf32> -> vector<40x256xf32>
    %39 = vector.shape_cast %38 : vector<40x256xf32> to vector<5x8x256xf32>
    %c0_19 = arith.constant 0 : index
    %c0_20 = arith.constant 0 : index
    %40 = vector.load %arg6[%c0_19, %c0_20] : memref<5x1xf32, #tpu.memory_space<vmem>>, vector<5x1xf32>
    %41 = vector.shape_cast %40 : vector<5x1xf32> to vector<5x1x1xf32>
    %42 = vector.broadcast %41 : vector<5x1x1xf32> to vector<5x8x256xf32>
    %43 = arith.addf %39, %42 : vector<5x8x256xf32>
    %cst_21 = arith.constant 0.000000e+00 : f32
    %44 = vector.broadcast %cst_21 : f32 to vector<5x8x256xf32>
    %45 = arith.cmpf oge, %43, %44 : vector<5x8x256xf32>
    %cst_22 = arith.constant 0.00999999977 : f32
    %46 = vector.broadcast %cst_22 : f32 to vector<5x8x256xf32>
    %47 = arith.mulf %46, %43 : vector<5x8x256xf32>
    %48 = arith.select %45, %43, %47 : vector<5x8x256xi1>, vector<5x8x256xf32>
    %49 = vector.extract_strided_slice %48 {offsets = [0, 0, 0], sizes = [4, 8, 256], strides = [1, 1, 1]} : vector<5x8x256xf32> to vector<4x8x256xf32>
    %50 = vector.extract_strided_slice %48 {offsets = [4, 0, 0], sizes = [1, 8, 256], strides = [1, 1, 1]} : vector<5x8x256xf32> to vector<1x8x256xf32>
    %51 = vector.broadcast %50 : vector<1x8x256xf32> to vector<4x8x256xf32>
    %52 = arith.addf %51, %49 : vector<4x8x256xf32>
    %cst_23 = arith.constant dense<0.000000e+00> : vector<8x256xf32>
    %53 = vector.multi_reduction <add>, %49, %cst_23 [0] : vector<4x8x256xf32> to vector<8x256xf32>
    %54 = vector.shape_cast %53 : vector<8x256xf32> to vector<1x8x256xf32>
    %cst_24 = arith.constant 4.000000e+00 : f32
    %55 = vector.broadcast %cst_24 : f32 to vector<1x8x256xf32>
    %56 = arith.divf %54, %55 : vector<1x8x256xf32>
    %57 = vector.broadcast %56 : vector<1x8x256xf32> to vector<4x8x256xf32>
    %58 = arith.subf %52, %57 : vector<4x8x256xf32>
    %c0_25 = arith.constant 0 : index
    %c0_26 = arith.constant 0 : index
    %c0_27 = arith.constant 0 : index
    %c0_28 = arith.constant 0 : index
    %59 = vector.load %arg7[%c0_25, %c0_26, %c0_27, %c0_28] : memref<1x4x8x256xf32, #tpu.memory_space<vmem>>, vector<1x4x8x256xf32>
    %60 = vector.shape_cast %59 : vector<1x4x8x256xf32> to vector<4x8x256xf32>
    %61 = vector.shape_cast %58 : vector<4x8x256xf32> to vector<1x4x8x256xf32>
    tpu.vector_store %arg7[%c0_25, %c0_26, %c0_27, %c0_28], %61 {strides = array<i32>} : memref<1x4x8x256xf32, #tpu.memory_space<vmem>>, vector<1x4x8x256xf32>,
    return
  }
  func.func @transform_0(%arg0: i32) -> (i32, i32, i32) {
    %c0_i32 = arith.constant 0 : i32
    %c0_i32_0 = arith.constant 0 : i32
    %c0_i32_1 = arith.constant 0 : i32
    return %arg0, %c0_i32, %c0_i32_0 : i32, i32, i32
  }
  func.func @transform_1(%arg0: i32) -> (i32, i32) {
    %c0_i32 = arith.constant 0 : i32
    %c0_i32_0 = arith.constant 0 : i32
    %c0_i32_1 = arith.constant 0 : i32
    return %c0_i32, %c0_i32_0 : i32, i32
  }
  func.func @transform_2(%arg0: i32) -> (i32, i32, i32) {
    %c0_i32 = arith.constant 0 : i32
    %c0_i32_0 = arith.constant 0 : i32
    %c0_i32_1 = arith.constant 0 : i32
    return %arg0, %c0_i32, %c0_i32_0 : i32, i32, i32
  }
  func.func @transform_3(%arg0: i32) -> (i32, i32) {
    %c0_i32 = arith.constant 0 : i32
    %c0_i32_0 = arith.constant 0 : i32
    %c0_i32_1 = arith.constant 0 : i32
    return %c0_i32, %c0_i32_0 : i32, i32
  }
  func.func @transform_4(%arg0: i32) -> (i32, i32) {
    %c0_i32 = arith.constant 0 : i32
    %c0_i32_0 = arith.constant 0 : i32
    %c0_i32_1 = arith.constant 0 : i32
    return %c0_i32, %c0_i32_0 : i32, i32
  }
  func.func @transform_5(%arg0: i32) -> (i32, i32) {
    %c0_i32 = arith.constant 0 : i32
    %c0_i32_0 = arith.constant 0 : i32
    %c0_i32_1 = arith.constant 0 : i32
    return %c0_i32, %c0_i32_0 : i32, i32
  }
  func.func @transform_6(%arg0: i32) -> (i32, i32, i32, i32) {
    %c0_i32 = arith.constant 0 : i32
    %c0_i32_0 = arith.constant 0 : i32
    %c0_i32_1 = arith.constant 0 : i32
    %c0_i32_2 = arith.constant 0 : i32
    return %arg0, %c0_i32, %c0_i32_0, %c0_i32_1 : i32, i32, i32, i32
  }
}

</mosaic_0001>

<bundles_post_ra>
// kernel: iqn_forward.1
= control target key start
LH: loop header
LB: loop body
LE: loop exit
PB: predicated region body
PF: predicated region fallthrough
CT: control target
= control target key end

     0   :  { %s1210_s21 = smov 0   ;;  %s1382_s0 = inlined_call_operand.vmem [shape: f32[2,101,256], index: 0, kind: input, shape index: {}]   ;;  %s1383_s1 = inlined_call_operand.vmem [shape: f32[32,101], index: 1, kind: input, shape index: {}]   ;;  %s1384_s2 = inlined_call_operand.vmem [shape: f32[2,8,1], index: 2, kind: input, shape index: {}]   ;;  %s1385_s3 = inlined_call_operand.vmem [shape: f32[33,32], index: 3, kind: input, shape index: {}]   ;;  %s1386_s4 = inlined_call_operand.vmem [shape: f32[5,32], index: 4, kind: input, shape index: {}]   ;;  %s1387_s5 = inlined_call_operand.vmem [shape: f32[5,1], index: 5, kind: input, shape index: {}]   ;;  %s1388_s6 = inlined_call_operand.vmem [shape: f32[2,4,8,256], index: 6, kind: output, shape index: {}]  }
   0x1 LB: > { %s1038_s22 = sadd.s32 4294967295, %s1162_s21   ;;  %p1042_p0 = scmp.ge.s32.totalorder %s1162_s21, 1  ;;  %s1162_s21 = sphi %s1210_s21, %s16_s21  }
   0x2   : > { %p221_p1 = scmp.lt.s32.totalorder %s1162_s21, 3 }
   0x4   : > { %p222_p2 = pnand %p1042_p0, %p221_p1 }
   0x5   : > { %p255_p3 = scmp.lt.s32.totalorder (!%p222_p2), %s1038_s22, 1  ;;  %v433_v0 = vlaneseq (!%p222_p2)  ;;  %v1164_v1 = vmov (!%p222_p2), 0   ;;  %v1165_v2 = vmov (!%p222_p2), 1966171168   ;;  %v1225_v6 = vld [vmem:[%s1387_s5] sm:$0x1f] (!%p222_p2) }
   0x6   : > { %225 = sbr.rel (%p222_p2) target bundleno = 686 (0x2ae), region = 44  ;;  %1148 = vset.pattern.permute.xlu0 (!%p222_p2), %v1164_v1  ;;  %v639_v3 = vunpack.c.l.s4 (!%p222_p2), %v1165_v2  ;;  %1149 = vset.pattern.permute.xlu1 (!%p222_p2), %v1164_v1  ;;  %vm312_vm0 = vcmask (!%p222_p2), 1044480   ;;  %v1166_v55 = vmov (!%p222_p2), 0.0   ;;  %v269_v56 = vld [vmem:[%s1383_s1] sm:$0xff] (!%p222_p2)  ;;  %vm299_vm1 = vcmask (!%p222_p2), 826368   ;;  %v270_v57 = vld [vmem:[%s1383_s1 + $0x8] sm:$0xff] (!%p222_p2) }
   0x7   : > { %v642_v4 = vshrl.u32 (!%p222_p2), %v433_v0, 7  ;;  %383 = vmatprep.mubr.f32.mxu0 (!%p222_p2), %v1166_v55  ;;  %v271_v58 = vld [vmem:[%s1383_s1 + $0x10] sm:$0xff] (!%p222_p2)  ;;  %v549_v59 = vld [vmem:[%s1385_s3] sm:$0xff] (!%p222_p2)  ;;  %v1167_v60 = vmov (!%p222_p2), 0.0|0.0   ;;  %v550_v61 = vld [vmem:[%s1385_s3 + $0x8] sm:$0xff] (!%p222_p2)  ;;  %vm1168_vm2 = vmmov (!%p222_p2), 0  }
   0x8   : > { %v640_v5 = vunpack.c.0.s8 (!%p222_p2), %v639_v3  ;;  %1110 = vmatprep.subr.bf16.mxu1 (!%p222_p2), %v1167_v60  ;;  %v551_v62 = vld [vmem:[%s1385_s3 + $0x10] sm:$0xff] (!%p222_p2)  ;;  %v552_v63 = vld [vmem:[%s1385_s3 + $0x18] sm:$0xff] (!%p222_p2)  ;;  %v1111_v2 = vpack.c.bf16 (!%p222_p2), %v550_v61, %v549_v59  ;;  %1083 = vmatprep.mubr.msk.f32.mxu1 (!%p222_p2), %vm1168_vm2, %v1166_v55  ;;  %vm558_vm3 = vcmask (!%p222_p2), 1040384   ;;  %vm554_vm2 = vcmask (!%p222_p2), 269312  }
   0x9   : > { %v1232_v9 = vsub.s32 (!%p222_p2), 0, %v642_v4  ;;  %v272_v1 = vld [vmem:[%s1383_s1 + $0x18] sm:$0xff] (!%p222_p2)  ;;  %v1114_v3 = vpack.c.bf16 (!%p222_p2), %v552_v63, %v551_v62 }
   0xa   : > { %v1230_v7 = vsub.s32 (!%p222_p2), %v640_v5, %v642_v4  ;;  %1112 = vmatpush3.bf16.msra.mxu1 (!%p222_p2), %v1111_v2  ;;  %v553_v4 = vld [vmem:[%s1385_s3 + $0x20] sm:$0x1] (!%p222_p2)  ;;  %v1317_v5 = vand.u32 (!%p222_p2), 127, %v433_v0 }
   0xb   : > { %1113 = vmatprep.subr.bf16.mxu1 (!%p222_p2), %v1167_v60 }
   0xc   : > { %v826_v10 = vrot.slane (!%p222_p2), %v1225_v6, %v1230_v7  ;;  %vm435_vm15 = vcmp.lt.s32.totalorder (!%p222_p2), %v1317_v5, 32 }
   0xd   : > { %s1390_s22 = smov (!%p255_p3, %s1038_s22), 1 }
   0xe   : > { %s1044_s23 = sshll.u32 %s1390_s22, 3  ;;  %v1237_v11 = vrot.slane %v826_v10, %v1230_v7  ;;  %v834_v12 = vcombine.high %v826_v10, %v826_v10  ;;  %s1124_s29 = smul.u32 208, %s1390_s22  ;;  %1115 = vmatpush3.bf16.msra.mxu1 %v1114_v3 }
   0xf   : > { %s263_s28 = scalar_lea.vmem %s1384_s2, %s1044_s23  ;;  %1081 = vmatprep.subr.mxu1 %v1166_v55  ;;  %s1066_s7 = sshll.u32 %s1390_s22, 6 }
  0x10   : > { %v432_v8 = vld [vmem:[%s263_s28] sm:$0xff]  ;;  %v861_v13 = vrot.slane %v1237_v11, %v1232_v9  ;;  %v1242_v14 = vrot.slane %v834_v12, %v1230_v7  ;;  %s1251_s8 = scalar_lea.vmem %s1382_s0, %s1124_s29  ;;  %s268_s10 = scalar_lea.vmem %s1388_s6, %s1066_s7 }
  0x11   : > { %441 = vperm.xlu0 %1148, %v432_v8   ;;  %v274_v17 = vld [vmem:[%s1251_s8 + $0x8] sm:$0xff]  ;;  %v276_v18 = vld [vmem:[%s1251_s8 + $0x18] sm:$0xff]  ;;  %v273_v20 = vld [vmem:[%s1251_s8] sm:$0xff]  ;;  %v436_v8 = vadd.s32 1, %v1317_v5 }
  0x12   : > { %v857_v15 = vcombine.high %v1242_v14, %v1242_v14  ;;  %v1086_v19 = vpack.c.bf16 %v276_v18, %v274_v17  ;;  %v275_v21 = vld [vmem:[%s1251_s8 + $0x10] sm:$0xff]  ;;  %v278_v23 = vld [vmem:[%s1251_s8 + $0x28] sm:$0xff]  ;;  %v280_v24 = vld [vmem:[%s1251_s8 + $0x38] sm:$0xff]  ;;  %1082 = vmatpush3.msk.msra.mxu1 %vm558_vm3, %v553_v4 }
  0x13   : > { %v1088_v22 = vpack.c.bf16 %v275_v21, %v273_v20  ;;  %v1090_v25 = vpack.c.bf16 %v280_v24, %v278_v23  ;;  %v277_v26 = vld [vmem:[%s1251_s8 + $0x20] sm:$0xff]  ;;  %v279_v27 = vld [vmem:[%s1251_s8 + $0x30] sm:$0xff]  ;;  %v282_v29 = vld [vmem:[%s1251_s8 + $0x48] sm:$0xff]  ;;  %v437_v10 = vcvt.s32.f32 %v436_v8 }
  0x14   : > { %v873_v16 = vrot.slane %v857_v15, %v1232_v9  ;;  %1087 = vmatprep.subr.bf16.mxu0 %v1086_v19  ;;  %v1092_v28 = vpack.c.bf16 %v279_v27, %v277_v26  ;;  %v284_v30 = vld [vmem:[%s1251_s8 + $0x58] sm:$0xff]  ;;  %v281_v32 = vld [vmem:[%s1251_s8 + $0x40] sm:$0xff]  ;;  %v283_v33 = vld [vmem:[%s1251_s8 + $0x50] sm:$0xff]  ;;  %v1170_v27 = vmov 2475754826  }
  0x15   : > { %879 = vperm.xlu0 %1148, %v861_v13   ;;  %1089 = vmatpush1.bf16.msra.mxu0 %v1088_v22  ;;  %v1094_v31 = vpack.c.bf16 %v284_v30, %v282_v29  ;;  %v1096_v34 = vpack.c.bf16 %v283_v33, %v281_v32  ;;  %v286_v35 = vld [vmem:[%s1251_s8 + $0x68] sm:$0xff]  ;;  %v288_v36 = vld [vmem:[%s1251_s8 + $0x78] sm:$0xff]  ;;  %v285_v38 = vld [vmem:[%s1251_s8 + $0x60] sm:$0xff]  ;;  %v438_v12 = vmul.f32 3.1415927, %v437_v10 }
  0x16   : > { %1091 = vmatprep.subr.bf16.mxu0 %v1090_v25  ;;  %v1098_v37 = vpack.c.bf16 %v288_v36, %v286_v35  ;;  %v287_v39 = vld [vmem:[%s1251_s8 + $0x70] sm:$0xff]  ;;  %v290_v41 = vld [vmem:[%s1251_s8 + $0x88] sm:$0xff]  ;;  %v292_v42 = vld [vmem:[%s1251_s8 + $0x98] sm:$0xff]  ;;  %v1169_v25 = vmov 683565275  }
  0x17   : > { %v1100_v40 = vpack.c.bf16 %v287_v39, %v285_v38  ;;  %v1102_v43 = vpack.c.bf16 %v292_v42, %v290_v41  ;;  %v289_v44 = vld [vmem:[%s1251_s8 + $0x80] sm:$0xff]  ;;  %v291_v45 = vld [vmem:[%s1251_s8 + $0x90] sm:$0xff]  ;;  %v294_v47 = vld [vmem:[%s1251_s8 + $0xa8] sm:$0xff]  ;;  %v1171_v30 = vmov 2131351028  }
  0x18   : > { %v1104_v46 = vpack.c.bf16 %v291_v45, %v289_v44  ;;  %v296_v48 = vld [vmem:[%s1251_s8 + $0xb8] sm:$0xff]  ;;  %v293_v50 = vld [vmem:[%s1251_s8 + $0xa0] sm:$0xff]  ;;  %v295_v51 = vld [vmem:[%s1251_s8 + $0xb0] sm:$0xff]  ;;  %v1172_v33 = vmov 2102212464  }
  0x19   : > { %891 = vperm.xlu0 %1148, %v873_v16   ;;  %1093 = vmatpush1.bf16.msra.mxu0 %v1092_v28  ;;  %v1106_v49 = vpack.c.bf16 %v296_v48, %v294_v47  ;;  %v1108_v52 = vpack.c.bf16 %v295_v51, %v293_v50  ;;  %v298_v53 = vld [vmem:[%s1251_s8 + $0xc8] sm:$0x1f]  ;;  %v297_v54 = vld [vmem:[%s1251_s8 + $0xc0] sm:$0x1f]  ;;  %v1173_v36 = vmov 920167782  }
  0x1a   : > { %1095 = vmatprep.subr.bf16.mxu0 %v1094_v31  ;;  %v1174_v39 = vmov 1326507024  }
  0x1d   : > { %1097 = vmatpush1.bf16.msra.mxu0 %v1096_v34 }
  0x1e   : > { %1099 = vmatprep.subr.bf16.mxu0 %v1098_v37 }
  0x21   : > { %1101 = vmatpush1.bf16.msra.mxu0 %v1100_v40 }
  0x22   : > { %1103 = vmatprep.subr.bf16.mxu0 %v1102_v43 }
  0x25   : > { %1105 = vmatpush1.bf16.msra.mxu0 %v1104_v46 }
  0x26   : > { %1107 = vmatprep.subr.bf16.mxu0 %v1106_v49 }
  0x29   : > { %1109 = vmatpush1.bf16.msra.mxu0 %v1108_v52 }
  0x2a   : > { %1047 = vmatprep.subr.msk.mxu0 %vm312_vm0, %v298_v53 }
  0x2d   : > { %1048 = vmatpush1.msk.msra.mxu0 %vm312_vm0, %v297_v54 }
  0x2e   : > { %1049 = vmatmul.mubr.msk.f32.vlgmr.msra.gmra.mrb[0].mxu0 %vm299_vm1, %v269_v56 }
  0x2f   : > { %389 = vmatprep.mubr.f32.mxu0 %v1166_v55 }
  0x32   : > { %1050 = vmatmul.mubr.msk.f32.gmra.mrb[2].mxu0 %vm299_vm1, %v270_v57 }
  0x33   : > { %395 = vmatprep.mubr.f32.mxu0 %v1166_v55 }
  0x36   : > { %1051 = vmatmul.mubr.msk.f32.gmra.mrb[4].mxu0 %vm299_vm1, %v271_v58 }
  0x37   : > { %401 = vmatprep.mubr.f32.mxu0 %v1166_v55 }
  0x3a   : > { %1052 = vmatmul.mubr.msk.f32.gmra.mrb[6].mxu0 %vm299_vm1, %v272_v1 }
  0x90   : > { %v442_v13 = vpop.permute.xlu0 %441 }
  0x91   : > { %v1320_v15 = vmul.f32 %v442_v13, %v438_v12 }
  0x93   : > { %v448_v16 = vand.u32 2139095040, %v1320_v15  ;;  %v445_v20 = vand.u32 2147483647, %v1320_v15  ;;  %vm447_vm11 = vcmp.lt.s32.totalorder %v1320_v15, 0  ;;  %vm537_vm1 = vweird.f32 %v1320_v15 }
  0x95   : > { %v449_v17 = vshrl.u32 %v448_v16, 23  ;;  %v452_v0 = vand.u32 8388607, %v445_v20  ;;  %vm446_vm12 = vcmp.le.f32.partialorder %v445_v20, 0.7853982 }
  0x97   : > { %v1053_v18 = vadd.s32 4294967169, %v449_v17  ;;  %v453_v41 = vor.u32 8388608, %v452_v0 }
  0x99   : > { %v455_v19 = vadd.s32 1, %v1053_v18  ;;  %v493_v56 = vshll.u32 %v453_v41, 8 }
  0x9b   : > { %vm456_vm4 = vcmp.gt.s32.totalorder %v455_v19, 0 }
  0x9c   : > { %v457_v21 = vsel %vm456_vm4, %v455_v19, 0 }
  0x9d   : > { %v459_v22 = vand.u32 31, %v457_v21  ;;  %v458_v24 = vshrl.u32 %v457_v21, 5 }
  0x9f   : > { %v460_v23 = vsub.s32 32, %v459_v22  ;;  %v462_v26 = vshll.u32 %v1169_v25, %v459_v22  ;;  %v465_v28 = vshll.u32 %v1170_v27, %v459_v22  ;;  %v468_v32 = vshll.u32 %v1171_v30, %v459_v22 }
  0xa0   : > { %v471_v35 = vshll.u32 %v1172_v33, %v459_v22  ;;  %v474_v38 = vshll.u32 %v1173_v36, %v459_v22  ;;  %vm477_vm5 = vcmp.lt.s32.totalorder %v458_v24, 1  ;;  %vm480_vm6 = vcmp.lt.s32.totalorder %v458_v24, 4 }
  0xa1   : > { %v463_v29 = vshrl.u32 %v1170_v27, %v460_v23  ;;  %v466_v31 = vshrl.u32 %v1171_v30, %v460_v23  ;;  %v469_v34 = vshrl.u32 %v1172_v33, %v460_v23  ;;  %v472_v37 = vshrl.u32 %v1173_v36, %v460_v23 }
  0xa2   : > { %v475_v40 = vshrl.u32 %v1174_v39, %v460_v23  ;;  %v461_v50 = vshrl.u32 %v1169_v25, %v460_v23  ;;  %vm479_vm7 = vcmp.lt.s32.totalorder %v458_v24, 3  ;;  %vm478_vm8 = vcmp.lt.s32.totalorder %v458_v24, 2 }
  0xa3   : > { %v464_v42 = vor.u32 %v463_v29, %v462_v26  ;;  %v467_v43 = vor.u32 %v466_v31, %v465_v28  ;;  %v470_v44 = vor.u32 %v469_v34, %v468_v32  ;;  %v473_v45 = vor.u32 %v472_v37, %v471_v35 }
  0xa4   : > { %v476_v46 = vor.u32 %v475_v40, %v474_v38 }
  0xa5   : > { %v482_v47 = vsel %vm480_vm6, %v470_v44, 2102212464  ;;  %v485_v48 = vsel %vm477_vm5, %v464_v42, %v467_v43  ;;  %v489_v49 = vsel %vm477_vm5, %v467_v43, %v470_v44  ;;  %v486_v51 = vsel %vm480_vm6, %v473_v45, 920167782 }
  0xa6   : > { %v490_v52 = vsel %vm480_vm6, %v476_v46, 1326507024  ;;  %v487_v53 = vsel %vm479_vm7, %v470_v44, %v486_v51  ;;  %v481_v57 = vsel %vm477_vm5, %v461_v50, %v464_v42  ;;  %v483_v58 = vsel %vm479_vm7, %v467_v43, %v482_v47 }
  0xa7   : > { %v491_v54 = vsel %vm479_vm7, %v473_v45, %v490_v52  ;;  %v488_v59 = vsel %vm478_vm8, %v485_v48, %v487_v53  ;;  %v484_v2 = vsel %vm478_vm8, %v481_v57, %v483_v58 }
  0xa8   : > { %v492_v60 = vsel %vm478_vm8, %v489_v49, %v491_v54  ;;  %v1329_v63 = vmul.u32.u64.low %v493_v56, %v488_v59  ;;  %v1330_v1 = vmul.u32.u64.high %v493_v56, %v488_v59, %v1329_v63  ;;  %v500_v4 = vmul.u32 %v493_v56, %v484_v2 }
  0xa9   : > { %v1326_v61 = vmul.u32.u64.low %v493_v56, %v492_v60  ;;  %v1327_v62 = vmul.u32.u64.high %v493_v56, %v492_v60, %v1326_v61 }
  0xaa   : > { %v503_v3 = vadd.s32 1, %v1330_v1 }
  0xab   : > { %vm502_vm9 = vc.u32 %v1327_v62, %v1329_v63  ;;  %v501_v23 = vadd.s32 %v1329_v63, %v1327_v62 }
  0xac   : > { %v504_v8 = vsel %vm502_vm9, %v503_v3, %v1330_v1 }
  0xad   : > { %v505_v10 = vadd.s32 %v504_v8, %v500_v4 }
  0xaf   : > { %v506_v12 = vadd.s32 536870912, %v505_v10 }
  0xb1   : > { %v507_v13 = vshrl.u32 %v506_v12, 30 }
  0xb3   : > { %v508_v16 = vshll.u32 %v507_v13, 30  ;;  %v531_v37 = vsub.s32 4, %v507_v13 }
  0xb5   : > { %v509_v17 = vsub.s32 %v505_v10, %v508_v16  ;;  %v532_v39 = vsel %vm447_vm11, %v531_v37, %v507_v13 }
  0xb6   : > { %v534_v40 = vsel %vm446_vm12, 0, %v532_v39 }
  0xb7   : > { %v511_v18 = vsub.s32 0, %v509_v17  ;;  %v538_v41 = vand.u32 3, %v534_v40 }
  0xb9   : > { %v1054_v19 = vmin.u32 %v511_v18, %v509_v17  ;;  %vm543_vm13 = vcmp.eq.s32.totalorder %v538_v41, 2  ;;  %vm540_vm14 = vcmp.eq.s32.totalorder %v538_v41, 0  ;;  %vm539_vm0 = vcmp.lt.s32.totalorder %v538_v41, 2 }
  0xbb   : > { %v513_v21 = vclz %v1054_v19 }
  0xbd   : > { %v1055_v22 = vadd.s32 4294967294, %v513_v21 }
  0xbf   : > { %vm1056_vm10 = vcmp.lt.s32.totalorder %v1055_v22, 0 }
  0xc0   : > { %v516_v0 = vsel %vm1056_vm10, 0, %v1055_v22  ;;  %v865_v22 = vrot.slane %v1242_v14, %v1232_v9  ;;  %v635_v14 = vld [vmem:[%s1386_s4] sm:$0x1f] }
  0xc1   : > { %v517_v24 = vsub.s32 32, %v516_v0  ;;  %v521_v25 = vsub.s32 4294967266, %v516_v0  ;;  %v518_v26 = vshll.u32 %v509_v17, %v516_v0  ;;  %v856_v0 = vcombine.high %v1237_v11, %v1237_v11 }
  0xc2   : > { %883 = vperm.xlu1 %1149, %v865_v22   ;;  %v644_v11 = vrot.slane %v635_v14, %v1230_v7 }
  0xc3   : > { %v519_v27 = vshrl.u32 %v501_v23, %v517_v24  ;;  %v522_v28 = vadd.s32 127, %v521_v25  ;;  %v819_v23 = vcombine.high %v1225_v6, %v1225_v6  ;;  %v869_v24 = vrot.slane %v856_v0, %v1232_v9 }
  0xc4   : > { %v652_v6 = vcombine.high %v644_v11, %v644_v11 }
  0xc5   : > { %v520_v29 = vor.u32 %v519_v27, %v518_v26  ;;  %v523_v30 = vshll.u32 %v522_v28, 23  ;;  %v833_v25 = vrot.slane %v819_v23, %v1230_v7  ;;  %v659_v28 = vrot.slane %v644_v11, %v1230_v7 }
  0xc6   : > { %887 = vperm.xlu1 %1149, %v869_v24  }
  0xc7   : > { %v524_v31 = vor.u32 4788187, %v523_v30  ;;  %v527_v33 = vcvt.s32.f32 %v520_v29  ;;  %v848_v26 = vrot.slane %v833_v25, %v1230_v7  ;;  %v679_v30 = vrot.slane %v659_v28, %v1232_v9 }
  0xc8   : > { %v674_v37 = vcombine.high %v659_v28, %v659_v28 }
  0xc9   : > { %v525_v32 = vand.u32 2147483647, %v524_v31  ;;  %v877_v27 = vrot.slane %v848_v26, %v1232_v9 }
  0xca   : > { %v687_v40 = vrot.slane %v674_v37, %v1232_v9 }
  0xcb   : > { %v528_v34 = vmul.f32 %v527_v33, %v525_v32  ;;  %895 = vperm.xlu1 %1149, %v877_v27   ;;  %v673_v33 = vrot.slane %v652_v6, %v1230_v7 }
  0xcd   : > { %v529_v35 = vxor.u32 2147483648, %v528_v34  ;;  %v675_v41 = vcombine.high %v673_v33, %v673_v33 }
  0xcf   : > { %v530_v36 = vsel %vm447_vm11, %v529_v35, %v528_v34 }
  0xd0   : > { %v533_v38 = vsel %vm446_vm12, %v1320_v15, %v530_v36  ;;  %vm706_vm12 = vcmask 261120   ;;  %v683_v36 = vrot.slane %v673_v33, %v1232_v9 }
  0xd1   : > { %1152 = vcosq.f32 %v533_v38 }
  0xd2   : > { %1154 = vsinq.f32 %v533_v38  ;;  %v637_v38 = vcombine.high %v635_v14, %v635_v14 }
  0xdb   : > { %v1153_v42 = vpop.eup %1152 }
  0xdc   : > { %v1155_v43 = vpop.eup %1154  ;;  %v544_v44 = vxor.u32 2147483648, %v1153_v42 }
  0xdd   : > { %v541_v45 = vxor.u32 2147483648, %v1155_v43 }
  0xde   : > { %v545_v46 = vsel %vm543_vm13, %v544_v44, %v1155_v43  ;;  %v691_v44 = vrot.slane %v675_v41, %v1232_v9 }
  0xdf   : > { %v542_v20 = vsel %vm540_vm14, %v1153_v42, %v541_v45  ;;  %v651_v42 = vrot.slane %v637_v38, %v1230_v7 }
  0xe0   : > { %v546_v47 = vsel %vm539_vm0, %v542_v20, %v545_v46 }
  0xe1   : > { %v547_v48 = vsel %vm537_vm1, nan, %v546_v47  ;;  %v666_v45 = vrot.slane %v651_v42, %v1230_v7 }
  0xe2   : > { %v548_v49 = vsel %vm435_vm15, %v547_v48, 1.0  ;;  %v880_v48 = vpop.permute.xlu0 %879 }
  0xe3   : > { %1084 = vmatmul.mubr.msk.f32.vlgmr.msra.gmra.mrb[0].mxu1 %vm554_vm2, %v548_v49  ;;  %v695_v20 = vrot.slane %v666_v45, %v1232_v9 }
  0xe4   : > { %786 = vmatprep.mubr.f32.mxu1 %v1166_v55 }
 0x101   : > { %v385_v50 = vpop.f32.mrb[0].mxu0 }
 0x102   : > { %v416_v51 = vmul.f32 0.01, %v385_v50  ;;  %v387_v52 = vpop.f32.mrb[1].mxu0  ;;  %vm408_vm3 = vcmp.ge.f32.partialorder %v385_v50, 0.0 }
 0x103   : > { %v417_v53 = vmul.f32 0.01, %v387_v52  ;;  %vm409_vm4 = vcmp.ge.f32.partialorder %v387_v52, 0.0 }
 0x104   : > { %v424_v56 = vsel %vm408_vm3, %v385_v50, %v416_v51 }
 0x105   : > { %v391_v54 = vpop.f32.mrb[2].mxu0  ;;  %v425_v58 = vsel %vm409_vm4, %v387_v52, %v417_v53 }
 0x106   : > { %vm410_vm5 = vcmp.ge.f32.partialorder %v391_v54, 0.0  ;;  %v418_v5 = vmul.f32 0.01, %v391_v54  ;;  %v393_v57 = vpop.f32.mrb[3].mxu0 }
 0x107   : > { %vm411_vm6 = vcmp.ge.f32.partialorder %v393_v57, 0.0  ;;  %v419_v15 = vmul.f32 0.01, %v393_v57 }
 0x108   : > { %v426_v59 = vsel %vm410_vm5, %v391_v54, %v418_v5 }
 0x109   : > { %v1118_v60 = vpack.c.bf16 %v426_v59, %v424_v56  ;;  %v427_v61 = vsel %vm411_vm6, %v393_v57, %v419_v15  ;;  %v397_v62 = vpop.f32.mrb[4].mxu0 }
 0x10a   : > { %v420_v63 = vmul.f32 0.01, %v397_v62  ;;  %v399_v1 = vpop.f32.mrb[5].mxu0  ;;  %v1116_v2 = vpack.c.bf16 %v427_v61, %v425_v58  ;;  %vm412_vm7 = vcmp.ge.f32.partialorder %v397_v62, 0.0 }
 0x10b   : > { %v421_v3 = vmul.f32 0.01, %v399_v1  ;;  %vm413_vm8 = vcmp.ge.f32.partialorder %v399_v1, 0.0 }
 0x10c   : > { %1117 = vmatprep.subr.bf16.mxu1 %v1116_v2  ;;  %v428_v8 = vsel %vm412_vm7, %v397_v62, %v420_v63 }
 0x10d   : > { %v403_v4 = vpop.f32.mrb[6].mxu0  ;;  %1119 = vmatpush1.bf16.msra.mxu1 %v1118_v60  ;;  %v429_v13 = vsel %vm413_vm8, %v399_v1, %v421_v3 }
 0x10e   : > { %vm414_vm9 = vcmp.ge.f32.partialorder %v403_v4, 0.0  ;;  %v422_v10 = vmul.f32 0.01, %v403_v4  ;;  %v405_v12 = vpop.f32.mrb[7].mxu0 }
 0x10f   : > { %vm415_vm10 = vcmp.ge.f32.partialorder %v405_v12, 0.0  ;;  %v423_v16 = vmul.f32 0.01, %v405_v12 }
 0x110   : > { %v430_v17 = vsel %vm414_vm9, %v403_v4, %v422_v10 }
 0x111   : > { %v1122_v18 = vpack.c.bf16 %v430_v17, %v428_v8  ;;  %v431_v19 = vsel %vm415_vm10, %v405_v12, %v423_v16  ;;  %v892_v12 = vpop.permute.xlu0 %891 }
 0x112   : > { %v1120_v21 = vpack.c.bf16 %v431_v19, %v429_v13 }
 0x114   : > { %1121 = vmatprep.subr.bf16.mxu1 %v1120_v21 }
 0x115   : > { %1123 = vmatpush1.bf16.msra.mxu1 %v1122_v18 }
 0x141   : > { %v884_v52 = vpop.permute.xlu1 %883 }
 0x1b6   : > { %v628_v29 = vpop.f32.mrb[0].mxu1 }
 0x1b7   : > { %vm632_vm11 = vcmp.ge.f32.partialorder %v628_v29, 0.0  ;;  %v633_v31 = vmul.f32 0.01, %v628_v29  ;;  %v1085_v32 = vpop.f32.mrb[1].mxu1 }
 0x1b9   : > { %v634_v34 = vsel %vm632_vm11, %v628_v29, %v633_v31 }
 0x1ba   : > { %v701_v35 = vmul.f32 %v679_v30, %v634_v34  ;;  %v702_v39 = vmul.f32 %v683_v36, %v634_v34  ;;  %v703_v43 = vmul.f32 %v687_v40, %v634_v34  ;;  %v704_v46 = vmul.f32 %v691_v44, %v634_v34 }
 0x1bb   : > { %v705_v47 = vmul.f32 %v695_v20, %v634_v34 }
 0x1bc   : > { %1059 = vmatmul.mubr.msk.f32.vlgmr.msra.gmra.mrb[2].mxu1 %vm706_vm12, %v701_v35 }
 0x1bd   : > { %792 = vmatprep.mubr.f32.mxu1 %v1166_v55 }
 0x1c0   : > { %1060 = vmatmul.mubr.msk.f32.gmra.mrb[4].mxu1 %vm706_vm12, %v702_v39 }
 0x1c1   : > { %798 = vmatprep.mubr.f32.mxu1 %v1166_v55 }
 0x1c4   : > { %1061 = vmatmul.mubr.msk.f32.gmra.mrb[6].mxu1 %vm706_vm12, %v703_v43 }
 0x1c5   : > { %804 = vmatprep.mubr.f32.mxu1 %v1166_v55 }
 0x1c8   : > { %1062 = vmatmul.mubr.msk.f32.gmra.mrb[8].mxu1 %vm706_vm12, %v704_v46 }
 0x1c9   : > { %810 = vmatprep.mubr.f32.mxu1 %v1166_v55  ;;  %v888_v55 = vpop.permute.xlu1 %887 }
 0x1cc   : > { %1063 = vmatmul.mubr.msk.f32.gmra.mrb[10].mxu1 %vm706_vm12, %v705_v47 }
 0x1cd   : > { %v896_v25 = vpop.permute.xlu1 %895 }
 0x28f   : > { %v788_v49 = vpop.f32.mrb[2].mxu1 }
 0x290   : > { %v898_v50 = vadd.f32 %v880_v48, %v788_v49  ;;  %v790_v51 = vpop.f32.mrb[3].mxu1 }
 0x291   : > { %v899_v7 = vadd.f32 %v880_v48, %v790_v51 }
 0x292   : > { %v918_v54 = vmul.f32 0.01, %v898_v50  ;;  %vm908_vm13 = vcmp.ge.f32.partialorder %v898_v50, 0.0 }
 0x293   : > { %v794_v53 = vpop.f32.mrb[4].mxu1  ;;  %v919_v57 = vmul.f32 0.01, %v899_v7  ;;  %vm909_vm14 = vcmp.ge.f32.partialorder %v899_v7, 0.0 }
 0x294   : > { %v900_v56 = vadd.f32 %v884_v52, %v794_v53  ;;  %v796_v5 = vpop.f32.mrb[5].mxu1  ;;  %v928_v60 = vsel %vm908_vm13, %v898_v50, %v918_v54 }
 0x295   : > { %v901_v9 = vadd.f32 %v884_v52, %v796_v5  ;;  %v929_v1 = vsel %vm909_vm14, %v899_v7, %v919_v57 }
 0x296   : > { %vm910_vm15 = vcmp.ge.f32.partialorder %v900_v56, 0.0  ;;  %v920_v58 = vmul.f32 0.01, %v900_v56 }
 0x297   : > { %vm911_vm0 = vcmp.ge.f32.partialorder %v901_v9, 0.0  ;;  %v921_v15 = vmul.f32 0.01, %v901_v9  ;;  %v800_v59 = vpop.f32.mrb[6].mxu1 }
 0x298   : > { %v930_v61 = vsel %vm910_vm15, %v900_v56, %v920_v58  ;;  %v902_v62 = vadd.f32 %v888_v55, %v800_v59  ;;  %v802_v63 = vpop.f32.mrb[7].mxu1 }
 0x299   : > { %v946_v2 = vadd.f32 %v930_v61, %v928_v60  ;;  %v931_v3 = vsel %vm911_vm0, %v901_v9, %v921_v15  ;;  %v903_v4 = vadd.f32 %v888_v55, %v802_v63 }
 0x29a   : > { %v949_v8 = vadd.f32 %v931_v3, %v929_v1  ;;  %vm912_vm1 = vcmp.ge.f32.partialorder %v902_v62, 0.0  ;;  %v922_v10 = vmul.f32 0.01, %v902_v62 }
 0x29b   : > { %vm913_vm2 = vcmp.ge.f32.partialorder %v903_v4, 0.0  ;;  %v923_v13 = vmul.f32 0.01, %v903_v4  ;;  %v806_v16 = vpop.f32.mrb[8].mxu1 }
 0x29c   : > { %v932_v17 = vsel %vm912_vm1, %v902_v62, %v922_v10  ;;  %v904_v18 = vadd.f32 %v892_v12, %v806_v16  ;;  %v808_v19 = vpop.f32.mrb[9].mxu1 }
 0x29d   : > { %v947_v21 = vadd.f32 %v946_v2, %v932_v17  ;;  %v933_v22 = vsel %vm913_vm2, %v903_v4, %v923_v13  ;;  %v905_v0 = vadd.f32 %v892_v12, %v808_v19 }
 0x29e   : > { %v950_v23 = vadd.f32 %v949_v8, %v933_v22  ;;  %vm914_vm3 = vcmp.ge.f32.partialorder %v904_v18, 0.0  ;;  %v924_v24 = vmul.f32 0.01, %v904_v18 }
 0x29f   : > { %vm915_vm4 = vcmp.ge.f32.partialorder %v905_v0, 0.0  ;;  %v925_v26 = vmul.f32 0.01, %v905_v0  ;;  %v812_v27 = vpop.f32.mrb[10].mxu1 }
 0x2a0   : > { %v934_v14 = vsel %vm914_vm3, %v904_v18, %v924_v24  ;;  %v906_v11 = vadd.f32 %v896_v25, %v812_v27  ;;  %v814_v28 = vpop.f32.mrb[11].mxu1 }
 0x2a1   : > { %v948_v6 = vadd.f32 %v947_v21, %v934_v14  ;;  %v935_v29 = vsel %vm915_vm4, %v905_v0, %v925_v26  ;;  %v907_v30 = vadd.f32 %v896_v25, %v814_v28 }
 0x2a2   : > { %v951_v31 = vadd.f32 %v950_v23, %v935_v29  ;;  %vm916_vm5 = vcmp.ge.f32.partialorder %v906_v11, 0.0  ;;  %v926_v32 = vmul.f32 0.01, %v906_v11 }
 0x2a3   : > { %vm917_vm6 = vcmp.ge.f32.partialorder %v907_v30, 0.0  ;;  %v927_v33 = vmul.f32 0.01, %v907_v30  ;;  %v953_v34 = vmul.f32 0.25, %v948_v6 }
 0x2a4   : > { %v936_v35 = vsel %vm916_vm5, %v906_v11, %v926_v32  ;;  %v954_v40 = vmul.f32 0.25, %v951_v31 }
 0x2a5   : > { %v938_v36 = vadd.f32 %v936_v35, %v928_v60  ;;  %v940_v37 = vadd.f32 %v936_v35, %v930_v61  ;;  %v942_v38 = vadd.f32 %v936_v35, %v932_v17  ;;  %v944_v39 = vadd.f32 %v936_v35, %v934_v14 }
 0x2a6   : > { %v937_v41 = vsel %vm917_vm6, %v907_v30, %v927_v33 }
 0x2a7   : > { %v955_v42 = vsub.f32 %v938_v36, %v953_v34  ;;  %v957_v43 = vsub.f32 %v940_v37, %v953_v34  ;;  %v959_v44 = vsub.f32 %v942_v38, %v953_v34  ;;  %v961_v45 = vsub.f32 %v944_v39, %v953_v34 }
 0x2a8   : > { %v939_v46 = vadd.f32 %v937_v41, %v929_v1  ;;  %v941_v20 = vadd.f32 %v937_v41, %v931_v3  ;;  %v943_v47 = vadd.f32 %v937_v41, %v933_v22  ;;  %v945_v48 = vadd.f32 %v937_v41, %v935_v29 }
 0x2a9   : > { %963 = vst [vmem:[%s268_s10] sm:$0xff] %v955_v42  ;;  %965 = vst [vmem:[%s268_s10 + $0x10] sm:$0xff] %v957_v43 }
 0x2aa   : > { %967 = vst [vmem:[%s268_s10 + $0x20] sm:$0xff] %v959_v44  ;;  %969 = vst [vmem:[%s268_s10 + $0x30] sm:$0xff] %v961_v45  ;;  %v956_v49 = vsub.f32 %v939_v46, %v954_v40  ;;  %v958_v50 = vsub.f32 %v941_v20, %v954_v40  ;;  %v960_v51 = vsub.f32 %v943_v47, %v954_v40 }
 0x2ab   : > { %v962_v52 = vsub.f32 %v945_v48, %v954_v40 }
 0x2ac   : > { %964 = vst [vmem:[%s268_s10 + $0x8] sm:$0xff] %v956_v49  ;;  %966 = vst [vmem:[%s268_s10 + $0x18] sm:$0xff] %v958_v50 }
 0x2ad   : > { %968 = vst [vmem:[%s268_s10 + $0x28] sm:$0xff] %v960_v51  ;;  %970 = vst [vmem:[%s268_s10 + $0x38] sm:$0xff] %v962_v52 }
 0x2ae PF: > { %s16_s21 = sadd.s32 1, %s1162_s21  }
 0x2af   : > { %p13_p4 = scmp.ge.s32.totalorder %s16_s21, 4  }
 0x2b1   :  { %15 = sbr.rel (!%p13_p4) target bundleno = 1 (0x1), region = 77 }

</bundles_post_ra>
